<compile_context>
chip_gen: v5e
topology: v5e:2x2
jax: 0.10.0
libtpu: 0.0.40
codegen_flags: <defaults>
</compile_context>

<pallas_src>
import functools

import numpy as np
import jax
import jax.numpy as jnp
from jax.experimental import pallas as pl
from jax.experimental.pallas import tpu as pltpu

PAD = 0


def position_encoding_init(n_position, d_hid, padding_idx=None):
    """Exact numpy port of the torch sinusoid table."""
    def cal_angle(position, hid_idx):
        return position / np.power(10000, 2 * (hid_idx // 2) / d_hid)

    def get_posi_angle_vec(position):
        return [cal_angle(position, hid_j) for hid_j in range(d_hid)]

    sinusoid_table = np.array(
        [get_posi_angle_vec(pos_i) for pos_i in range(n_position)]
    )
    sinusoid_table[:, 0::2] = np.sin(sinusoid_table[:, 0::2])
    sinusoid_table[:, 1::2] = np.cos(sinusoid_table[:, 1::2])
    if padding_idx is not None:
        sinusoid_table[padding_idx] = 0.0
    return jnp.asarray(sinusoid_table, dtype=jnp.float32)


# ----------------------------------------------------------------------------
# Pallas kernel: the full n_layers encoder stack for one batch tile.
# grid = (B // Bt, n_layers); layer axis is innermost ("arbitrary"), out_ref is
# the VMEM-resident activation accumulator across layers.
# ----------------------------------------------------------------------------
def encoder_stack_kernel(
    x_ref, kmask_ref, qmask_ref,
    wqkv_ref, wo_ref, bo_ref,
    g1_ref, be1_ref,
    w1_ref, b1_ref, w2_ref, b2_ref,
    g2_ref, be2_ref,
    out_ref, attn_ref,
    *, eps,
):
    layer = pl.program_id(1)
    n_layers = pl.num_programs(1)
    Bt, L, D = out_ref.shape
    R = Bt * L

    # Seed the resident activation at layer 0.  out_ref keeps the same block
    # index along the layer axis, so it is only flushed to HBM once per batch
    # tile (after the last layer).
    @pl.when(layer == 0)
    def _():
        out_ref[...] = x_ref[...]

    x = out_ref[...]                              # (Bt, L, D) f32
    xf = x.reshape(R, D)                          # flat rows for MXU M-fill

    def layer_norm(h, g, b):
        mu = jnp.mean(h, axis=-1, keepdims=True)
        var = jnp.mean((h - mu) ** 2, axis=-1, keepdims=True)
        return (h - mu) * jax.lax.rsqrt(var + eps) * g + b

    # --- fused QKV projection (1/temperature folded into the Q columns) ---
    qkv = jnp.dot(xf.astype(jnp.bfloat16), wqkv_ref[...],
                  preferred_element_type=jnp.float32)       # (R, 3D) f32
    q = qkv[:, 0:D].reshape(Bt, L, D)
    k = qkv[:, D:2 * D].reshape(Bt, L, D)
    v = qkv[:, 2 * D:3 * D].reshape(Bt, L, D)

    # --- single-head scaled dot-product attention ---
    scores = jnp.einsum('bqd,bkd->bqk',
                        q.astype(jnp.bfloat16), k.astype(jnp.bfloat16),
                        preferred_element_type=jnp.float32)  # (Bt, L, L)
    scores = jnp.where(kmask_ref[...] > 0.0, -1e30, scores)  # (Bt,1,L) bcast
    scores = scores - jnp.max(scores, axis=-1, keepdims=True)
    e = jnp.exp(scores)
    attn = e * pl.reciprocal(jnp.sum(e, axis=-1, keepdims=True), approx=True)

    ctx = jnp.einsum('bqk,bkd->bqd',
                     attn.astype(jnp.bfloat16), v.astype(jnp.bfloat16),
                     preferred_element_type=jnp.float32)     # (Bt, L, D)
    proj = jnp.dot(ctx.reshape(R, D).astype(jnp.bfloat16), wo_ref[...],
                   preferred_element_type=jnp.float32) + bo_ref[...]

    # --- residual + LayerNorm 1 ---
    x1 = layer_norm(proj + xf, g1_ref[...], be1_ref[...])    # (R, D) f32

    # --- position-wise FFN ---
    f = jnp.dot(x1.astype(jnp.bfloat16), w1_ref[...],
                preferred_element_type=jnp.float32) + b1_ref[...]
    f = jnp.maximum(f, 0.0)
    f = jnp.dot(f.astype(jnp.bfloat16), w2_ref[...],
                preferred_element_type=jnp.float32) + b2_ref[...]

    # --- residual + LayerNorm 2 ---
    x2 = layer_norm(f + x1, g2_ref[...], be2_ref[...])       # (R, D) f32

    # --- zero out PAD query rows, store back into the resident activation ---
    qmask = qmask_ref[...].reshape(R, 1)
    out_ref[...] = jnp.where(qmask > 0.0, 0.0, x2).reshape(Bt, L, D)

    # Only the last layer's attention map is returned by the module.
    @pl.when(layer == n_layers - 1)
    def _():
        attn_ref[...] = attn


def encoder_stack_pallas(x, kmask, qmask, stacked, n_layers, batch_tile=None):
    B, L, D = x.shape
    Dff = stacked["w1"].shape[-1]
    Bt = B if batch_tile is None else batch_tile
    assert B % Bt == 0

    def act_spec(shape):
        return pl.BlockSpec((Bt,) + shape, lambda bi, l: (bi, 0, 0))

    def layer_spec(shape):
        # Per-layer weight slab; leading layer dim squeezed out of the kernel.
        return pl.BlockSpec((None,) + shape,
                            lambda bi, l: (l,) + (0,) * len(shape))

    kernel = functools.partial(encoder_stack_kernel, eps=1e-5)

    out, attn = pl.pallas_call(
        kernel,
        grid=(B // Bt, n_layers),
        in_specs=[
            act_spec((L, D)),          # x (only read at layer 0)
            act_spec((1, L)),          # key pad mask
            act_spec((L, 1)),          # query/output pad mask
            layer_spec((D, 3 * D)),    # fused Wqkv (bf16)
            layer_spec((D, D)),        # Wo (bf16)
            layer_spec((1, D)),        # bo
            layer_spec((1, D)),        # LN1 gamma
            layer_spec((1, D)),        # LN1 beta
            layer_spec((D, Dff)),      # FFN W1 (bf16)
            layer_spec((1, Dff)),      # FFN b1
            layer_spec((Dff, D)),      # FFN W2 (bf16)
            layer_spec((1, D)),        # FFN b2
            layer_spec((1, D)),        # LN2 gamma
            layer_spec((1, D)),        # LN2 beta
        ],
        out_specs=[
            act_spec((L, D)),          # enc_output (resident across layers)
            act_spec((L, L)),          # last-layer attention map
        ],
        out_shape=[
            jax.ShapeDtypeStruct((B, L, D), jnp.float32),
            jax.ShapeDtypeStruct((B, L, L), jnp.float32),
        ],
        compiler_params=pltpu.CompilerParams(
            dimension_semantics=("parallel", "arbitrary")),
    )(x, kmask, qmask,
      stacked["wqkv"], stacked["wo"], stacked["bo"],
      stacked["ln1_g"], stacked["ln1_b"],
      stacked["w1"], stacked["b1"], stacked["w2"], stacked["b2"],
      stacked["ln2_g"], stacked["ln2_b"])
    return out, attn


# ----------------------------------------------------------------------------
# Parameter prep: stack per-layer params, fuse QKV, fold temperature, cast
# matmul weights to bf16 (biases / LN params stay f32).
# ----------------------------------------------------------------------------
def prepare_stacked_params(layer_params, temperature):
    def stack(key):
        return jnp.stack([p[key] for p in layer_params])

    wq = stack("wq") / temperature          # fold 1/temperature into Q
    wk = stack("wk")
    wv = stack("wv")
    wqkv = jnp.concatenate([wq, wk, wv], axis=-1).astype(jnp.bfloat16)
    return {
        "wqkv": wqkv,
        "wo": stack("wo").astype(jnp.bfloat16),
        "bo": stack("bo"),
        "ln1_g": stack("ln1_g"), "ln1_b": stack("ln1_b"),
        "w1": stack("w1").astype(jnp.bfloat16),
        "b1": stack("b1"),
        "w2": stack("w2").astype(jnp.bfloat16),
        "b2": stack("b2"),
        "ln2_g": stack("ln2_g"), "ln2_b": stack("ln2_b"),
    }


# ----------------------------------------------------------------------------
# Encoder wrapper (glue: embedding lookup, mask construction, fused stack call)
# ----------------------------------------------------------------------------
def encoder_forward(enc_non_embedded, src_seq, src_pos, params, pos_table,
                    d_model, temper_value=0.5):
    x = src_seq + pos_table[src_pos]                       # frozen sinusoid PE
    pad = (enc_non_embedded == PAD).astype(jnp.float32)    # (B, L)
    kmask = pad[:, None, :]                                # (B, 1, L)
    qmask = pad[:, :, None]                                # (B, L, 1)

    temperature = float(np.power(d_model, temper_value))
    n_layers = len(params["layers"])
    stacked = prepare_stacked_params(params["layers"], temperature)

    out, attn = encoder_stack_pallas(x, kmask, qmask, stacked, n_layers)
    return out, [attn]


# ----------------------------------------------------------------------------
# Pure-JAX f32 reference (for a loose numerical cross-check)
# ----------------------------------------------------------------------------
def encoder_forward_ref(enc_non_embedded, src_seq, src_pos, params, pos_table,
                        d_model, temper_value=0.5, eps=1e-5):
    x = src_seq + pos_table[src_pos]
    pad = (enc_non_embedded == PAD)
    temperature = float(np.power(d_model, temper_value))

    def ln(h, g, b):
        mu = jnp.mean(h, axis=-1, keepdims=True)
        var = jnp.mean((h - mu) ** 2, axis=-1, keepdims=True)
        return (h - mu) * jax.lax.rsqrt(var + eps) * g + b

    attn = None
    for p in params["layers"]:
        q = x @ p["wq"]
        k = x @ p["wk"]
        v = x @ p["wv"]
        s = jnp.einsum('bqd,bkd->bqk', q, k) / temperature
        s = jnp.where(pad[:, None, :], -1e30, s)
        attn = jax.nn.softmax(s, axis=-1)
        ctx = jnp.einsum('bqk,bkd->bqd', attn, v)
        proj = ctx @ p["wo"] + p["bo"]
        x1 = ln(proj + x, p["ln1_g"], p["ln1_b"])
        f = jnp.maximum(x1 @ p["w1"] + p["b1"], 0.0)
        f = f @ p["w2"] + p["b2"]
        x2 = ln(f + x1, p["ln2_g"], p["ln2_b"])
        x = jnp.where(pad[:, :, None], 0.0, x2)
    return x, attn


def init_layer_params(key, d_model, d_inner):
    ks = jax.random.split(key, 8)
    s = 0.05
    return {
        "wq": s * jax.random.normal(ks[0], (d_model, d_model), jnp.float32),
        "wk": s * jax.random.normal(ks[1], (d_model, d_model), jnp.float32),
        "wv": s * jax.random.normal(ks[2], (d_model, d_model), jnp.float32),
        "wo": s * jax.random.normal(ks[3], (d_model, d_model), jnp.float32),
        "bo": jnp.zeros((1, d_model), jnp.float32),
        "ln1_g": jnp.ones((1, d_model), jnp.float32),
        "ln1_b": jnp.zeros((1, d_model), jnp.float32),
        "w1": s * jax.random.normal(ks[4], (d_model, d_inner), jnp.float32),
        "b1": 0.01 * jax.random.normal(ks[5], (1, d_inner), jnp.float32),
        "w2": s * jax.random.normal(ks[6], (d_inner, d_model), jnp.float32),
        "b2": 0.01 * jax.random.normal(ks[7], (1, d_model), jnp.float32),
        "ln2_g": jnp.ones((1, d_model), jnp.float32),
        "ln2_b": jnp.zeros((1, d_model), jnp.float32),
    }


if __name__ == "__main__":
    # small, module-consistent shapes
    B, L = 2, 8
    d_model = 32          # d_word_vec == d_model (asserted in module)
    d_inner = 64          # d_inner_hid
    n_layers = 3
    n_max_seq = 16
    n_position = n_max_seq + 1

    key = jax.random.PRNGKey(0)
    k_tok, k_seq, *k_layers = jax.random.split(key, 2 + n_layers)

    # token ids with trailing PAD (=0) in the second example
    lengths = np.array([L, 5])
    tok = np.zeros((B, L), dtype=np.int32)
    rng = np.random.default_rng(0)
    for b in range(B):
        tok[b, : lengths[b]] = rng.integers(1, 50, size=lengths[b])
    enc_non_embedded = jnp.asarray(tok)

    # positions: 1..len, 0 (PAD) elsewhere
    pos = np.zeros((B, L), dtype=np.int32)
    for b in range(B):
        pos[b, : lengths[b]] = np.arange(1, lengths[b] + 1)
    src_pos = jnp.asarray(pos)

    # already-embedded source sequence (B, L, d_model)
    src_seq = 0.1 * jax.random.normal(k_seq, (B, L, d_model), jnp.float32)

    pos_table = position_encoding_init(n_position, d_model, padding_idx=PAD)

    params = {
        "layers": [init_layer_params(k_layers[i], d_model, d_inner)
                   for i in range(n_layers)]
    }

    enc_output, enc_slf_attns = encoder_forward(
        enc_non_embedded, src_seq, src_pos, params, pos_table, d_model,
        temper_value=0.5)

    jax.block_until_ready(enc_output)
    jax.block_until_ready(enc_slf_attns[0])

    assert enc_output.shape == (B, L, d_model)
    assert enc_slf_attns[0].shape == (B, L, L)
    assert bool(jnp.all(jnp.isfinite(enc_output)))
    assert bool(jnp.all(jnp.isfinite(enc_slf_attns[0])))

    # loose cross-check vs pure f32 JAX reference (kernel uses bf16 matmuls)
    ref_out, ref_attn = encoder_forward_ref(
        enc_non_embedded, src_seq, src_pos, params, pos_table, d_model,
        temper_value=0.5)
    max_diff = float(jnp.max(jnp.abs(enc_output - ref_out)))
    assert max_diff < 0.15, f"kernel/reference mismatch: max diff {max_diff}"

    print("KERNEL_OK")
</pallas_src>

<mosaic_0001>
module attributes {stable_mosaic.version = 11 : i64} {
  func.func @encoder_stack_kernel(%arg0: i32, %arg1: i32, %arg2: memref<2x8x32xf32, #tpu.memory_space<vmem>>, %arg3: memref<2x1x8xf32, #tpu.memory_space<vmem>>, %arg4: memref<2x8x1xf32, #tpu.memory_space<vmem>>, %arg5: memref<1x32x96xbf16, #tpu.memory_space<vmem>>, %arg6: memref<1x32x32xbf16, #tpu.memory_space<vmem>>, %arg7: memref<1x1x32xf32, #tpu.memory_space<vmem>>, %arg8: memref<1x1x32xf32, #tpu.memory_space<vmem>>, %arg9: memref<1x1x32xf32, #tpu.memory_space<vmem>>, %arg10: memref<1x32x64xbf16, #tpu.memory_space<vmem>>, %arg11: memref<1x1x64xf32, #tpu.memory_space<vmem>>, %arg12: memref<1x64x32xbf16, #tpu.memory_space<vmem>>, %arg13: memref<1x1x32xf32, #tpu.memory_space<vmem>>, %arg14: memref<1x1x32xf32, #tpu.memory_space<vmem>>, %arg15: memref<1x1x32xf32, #tpu.memory_space<vmem>>, %arg16: memref<2x8x32xf32, #tpu.memory_space<vmem>>, %arg17: memref<2x8x8xf32, #tpu.memory_space<vmem>>) attributes {dimension_semantics = [#tpu.dimension_semantics<parallel>, #tpu.dimension_semantics<arbitrary>], iteration_bounds = array<i64: 1, 3>, scalar_prefetch = 0 : i64, scratch_operands = 0 : i64, tpu.core_type = #tpu.core_type<tc>, window_params = [{transform_indices = @transform_0, window_bounds = array<i64: 2, 8, 32>}, {transform_indices = @transform_1, window_bounds = array<i64: 2, 1, 8>}, {transform_indices = @transform_2, window_bounds = array<i64: 2, 8, 1>}, {transform_indices = @transform_3, window_bounds = array<i64: 1, 32, 96>}, {transform_indices = @transform_4, window_bounds = array<i64: 1, 32, 32>}, {transform_indices = @transform_5, window_bounds = array<i64: 1, 1, 32>}, {transform_indices = @transform_6, window_bounds = array<i64: 1, 1, 32>}, {transform_indices = @transform_7, window_bounds = array<i64: 1, 1, 32>}, {transform_indices = @transform_8, window_bounds = array<i64: 1, 32, 64>}, {transform_indices = @transform_9, window_bounds = array<i64: 1, 1, 64>}, {transform_indices = @transform_10, window_bounds = array<i64: 1, 64, 32>}, {transform_indices = @transform_11, window_bounds = array<i64: 1, 1, 32>}, {transform_indices = @transform_12, window_bounds = array<i64: 1, 1, 32>}, {transform_indices = @transform_13, window_bounds = array<i64: 1, 1, 32>}, {transform_indices = @transform_14, window_bounds = array<i64: 2, 8, 32>}, {transform_indices = @transform_15, window_bounds = array<i64: 2, 8, 8>}]} {
    %c0_i32 = arith.constant 0 : i32
    %0 = arith.cmpi eq, %arg1, %c0_i32 : i32
    %1 = arith.extui %0 : i1 to i32
    %c0_i32_0 = arith.constant 0 : i32
    %2 = arith.cmpi ne, %1, %c0_i32_0 : i32
    scf.if %2 {
      %c0_68 = arith.constant 0 : index
      %c0_69 = arith.constant 0 : index
      %c0_70 = arith.constant 0 : index
      %132 = vector.load %arg2[%c0_68, %c0_69, %c0_70] : memref<2x8x32xf32, #tpu.memory_space<vmem>>, vector<2x8x32xf32>
      %c0_71 = arith.constant 0 : index
      %c0_72 = arith.constant 0 : index
      %c0_73 = arith.constant 0 : index
      %133 = vector.load %arg16[%c0_71, %c0_72, %c0_73] : memref<2x8x32xf32, #tpu.memory_space<vmem>>, vector<2x8x32xf32>
      tpu.vector_store %arg16[%c0_71, %c0_72, %c0_73], %132 {strides = array<i32>} : memref<2x8x32xf32, #tpu.memory_space<vmem>>, vector<2x8x32xf32>,
    } else {
    }
    %c0 = arith.constant 0 : index
    %c0_1 = arith.constant 0 : index
    %c0_2 = arith.constant 0 : index
    %3 = vector.load %arg16[%c0, %c0_1, %c0_2] : memref<2x8x32xf32, #tpu.memory_space<vmem>>, vector<2x8x32xf32>
    %4 = vector.shape_cast %3 : vector<2x8x32xf32> to vector<16x32xf32>
    %5 = arith.truncf %4 : vector<16x32xf32> to vector<16x32xbf16>
    %c0_3 = arith.constant 0 : index
    %c0_4 = arith.constant 0 : index
    %c0_5 = arith.constant 0 : index
    %6 = vector.load %arg5[%c0_3, %c0_4, %c0_5] : memref<1x32x96xbf16, #tpu.memory_space<vmem>>, vector<1x32x96xbf16>
    %7 = vector.shape_cast %6 : vector<1x32x96xbf16> to vector<32x96xbf16>
    %cst = arith.constant dense<0.000000e+00> : vector<16x96xf32>
    %8 = tpu.matmul %5, %7, %cst {dimension_numbers = #tpu.dot_dimension_numbers<[1], [0], [0], [1], [0, 0, 1, 1], [], []>} : vector<16x32xbf16>, vector<32x96xbf16>, vector<16x96xf32> -> vector<16x96xf32>
    %9 = vector.extract_strided_slice %8 {offsets = [0, 0], sizes = [16, 32], strides = [1, 1]} : vector<16x96xf32> to vector<16x32xf32>
    %10 = vector.shape_cast %9 : vector<16x32xf32> to vector<2x8x32xf32>
    %11 = vector.extract_strided_slice %8 {offsets = [0, 32], sizes = [16, 32], strides = [1, 1]} : vector<16x96xf32> to vector<16x32xf32>
    %12 = vector.shape_cast %11 : vector<16x32xf32> to vector<2x8x32xf32>
    %13 = vector.extract_strided_slice %8 {offsets = [0, 64], sizes = [16, 32], strides = [1, 1]} : vector<16x96xf32> to vector<16x32xf32>
    %14 = vector.shape_cast %13 : vector<16x32xf32> to vector<2x8x32xf32>
    %15 = arith.truncf %10 : vector<2x8x32xf32> to vector<2x8x32xbf16>
    %16 = arith.truncf %12 : vector<2x8x32xf32> to vector<2x8x32xbf16>
    "tpu.trace_start"() <{level = 10 : i32, message = "bqd,bkd->bqk"}> : () -> ()
    %cst_6 = arith.constant dense<0.000000e+00> : vector<2x8x8xf32>
    %17 = tpu.matmul %15, %16, %cst_6 {dimension_numbers = #tpu.dot_dimension_numbers<[2], [2], [1], [1], [0, 0, 0, 1, 1, 1], [0], [0]>} : vector<2x8x32xbf16>, vector<2x8x32xbf16>, vector<2x8x8xf32> -> vector<2x8x8xf32>
    "tpu.trace_stop"() : () -> ()
    %c0_7 = arith.constant 0 : index
    %c0_8 = arith.constant 0 : index
    %c0_9 = arith.constant 0 : index
    %18 = vector.load %arg3[%c0_7, %c0_8, %c0_9] : memref<2x1x8xf32, #tpu.memory_space<vmem>>, vector<2x1x8xf32>
    %cst_10 = arith.constant 0.000000e+00 : f32
    %19 = vector.broadcast %cst_10 : f32 to vector<2x1x8xf32>
    %20 = arith.cmpf ogt, %18, %19 : vector<2x1x8xf32>
    %cst_11 = arith.constant -1.000000e+30 : f32
    %21 = vector.shape_cast %20 : vector<2x1x8xi1> to vector<2x1x8xi1>
    %22 = vector.broadcast %21 : vector<2x1x8xi1> to vector<2x8x8xi1>
    %23 = vector.broadcast %cst_11 : f32 to vector<2x8x8xf32>
    %24 = arith.select %22, %23, %17 : vector<2x8x8xi1>, vector<2x8x8xf32>
    %cst_12 = arith.constant dense<0xFF800000> : vector<2x8xf32>
    %25 = vector.multi_reduction <maximumf>, %24, %cst_12 [2] : vector<2x8x8xf32> to vector<2x8xf32>
    %26 = vector.shape_cast %25 : vector<2x8xf32> to vector<2x8x1xf32>
    %27 = vector.broadcast %26 : vector<2x8x1xf32> to vector<2x8x8xf32>
    %28 = arith.subf %24, %27 : vector<2x8x8xf32>
    %29 = math.exp %28 : vector<2x8x8xf32>
    %cst_13 = arith.constant dense<0.000000e+00> : vector<2x8xf32>
    %30 = vector.multi_reduction <add>, %29, %cst_13 [2] : vector<2x8x8xf32> to vector<2x8xf32>
    %31 = vector.shape_cast %30 : vector<2x8xf32> to vector<2x8x1xf32>
    %32 = tpu.reciprocal %31 {approx = true} : vector<2x8x1xf32> -> vector<2x8x1xf32>
    %33 = vector.broadcast %32 : vector<2x8x1xf32> to vector<2x8x8xf32>
    %34 = arith.mulf %29, %33 : vector<2x8x8xf32>
    %35 = arith.truncf %34 : vector<2x8x8xf32> to vector<2x8x8xbf16>
    %36 = arith.truncf %14 : vector<2x8x32xf32> to vector<2x8x32xbf16>
    "tpu.trace_start"() <{level = 10 : i32, message = "bqk,bkd->bqd"}> : () -> ()
    %cst_14 = arith.constant dense<0.000000e+00> : vector<2x8x32xf32>
    %37 = tpu.matmul %35, %36, %cst_14 {dimension_numbers = #tpu.dot_dimension_numbers<[2], [1], [1], [2], [0, 0, 0, 1, 1, 2], [0], [0]>} : vector<2x8x8xbf16>, vector<2x8x32xbf16>, vector<2x8x32xf32> -> vector<2x8x32xf32>
    "tpu.trace_stop"() : () -> ()
    %38 = vector.shape_cast %37 : vector<2x8x32xf32> to vector<16x32xf32>
    %39 = arith.truncf %38 : vector<16x32xf32> to vector<16x32xbf16>
    %c0_15 = arith.constant 0 : index
    %c0_16 = arith.constant 0 : index
    %c0_17 = arith.constant 0 : index
    %40 = vector.load %arg6[%c0_15, %c0_16, %c0_17] : memref<1x32x32xbf16, #tpu.memory_space<vmem>>, vector<1x32x32xbf16>
    %41 = vector.shape_cast %40 : vector<1x32x32xbf16> to vector<32x32xbf16>
    %cst_18 = arith.constant dense<0.000000e+00> : vector<16x32xf32>
    %42 = tpu.matmul %39, %41, %cst_18 {dimension_numbers = #tpu.dot_dimension_numbers<[1], [0], [0], [1], [0, 0, 1, 1], [], []>} : vector<16x32xbf16>, vector<32x32xbf16>, vector<16x32xf32> -> vector<16x32xf32>
    %c0_19 = arith.constant 0 : index
    %c0_20 = arith.constant 0 : index
    %c0_21 = arith.constant 0 : index
    %43 = vector.load %arg7[%c0_19, %c0_20, %c0_21] : memref<1x1x32xf32, #tpu.memory_space<vmem>>, vector<1x1x32xf32>
    %44 = vector.shape_cast %43 : vector<1x1x32xf32> to vector<1x32xf32>
    %45 = vector.broadcast %44 : vector<1x32xf32> to vector<16x32xf32>
    %46 = arith.addf %42, %45 : vector<16x32xf32>
    %47 = arith.addf %46, %4 : vector<16x32xf32>
    %c0_22 = arith.constant 0 : index
    %c0_23 = arith.constant 0 : index
    %c0_24 = arith.constant 0 : index
    %48 = vector.load %arg8[%c0_22, %c0_23, %c0_24] : memref<1x1x32xf32, #tpu.memory_space<vmem>>, vector<1x1x32xf32>
    %49 = vector.shape_cast %48 : vector<1x1x32xf32> to vector<1x32xf32>
    %c0_25 = arith.constant 0 : index
    %c0_26 = arith.constant 0 : index
    %c0_27 = arith.constant 0 : index
    %50 = vector.load %arg9[%c0_25, %c0_26, %c0_27] : memref<1x1x32xf32, #tpu.memory_space<vmem>>, vector<1x1x32xf32>
    %51 = vector.shape_cast %50 : vector<1x1x32xf32> to vector<1x32xf32>
    %cst_28 = arith.constant dense<0.000000e+00> : vector<16xf32>
    %52 = vector.multi_reduction <add>, %47, %cst_28 [1] : vector<16x32xf32> to vector<16xf32>
    %53 = vector.shape_cast %52 : vector<16xf32> to vector<16x1xf32>
    %cst_29 = arith.constant 3.200000e+01 : f32
    %54 = vector.broadcast %cst_29 : f32 to vector<16x1xf32>
    %55 = arith.divf %53, %54 : vector<16x1xf32>
    %56 = vector.broadcast %55 : vector<16x1xf32> to vector<16x32xf32>
    %57 = arith.subf %47, %56 : vector<16x32xf32>
    %58 = arith.mulf %57, %57 : vector<16x32xf32>
    %cst_30 = arith.constant dense<0.000000e+00> : vector<16xf32>
    %59 = vector.multi_reduction <add>, %58, %cst_30 [1] : vector<16x32xf32> to vector<16xf32>
    %60 = vector.shape_cast %59 : vector<16xf32> to vector<16x1xf32>
    %cst_31 = arith.constant 3.200000e+01 : f32
    %61 = vector.broadcast %cst_31 : f32 to vector<16x1xf32>
    %62 = arith.divf %60, %61 : vector<16x1xf32>
    %63 = vector.broadcast %55 : vector<16x1xf32> to vector<16x32xf32>
    %64 = arith.subf %47, %63 : vector<16x32xf32>
    %cst_32 = arith.constant 9.99999974E-6 : f32
    %65 = vector.broadcast %cst_32 : f32 to vector<16x1xf32>
    %66 = arith.addf %62, %65 : vector<16x1xf32>
    %67 = math.rsqrt %66 : vector<16x1xf32>
    %68 = vector.broadcast %67 : vector<16x1xf32> to vector<16x32xf32>
    %69 = arith.mulf %64, %68 : vector<16x32xf32>
    %70 = vector.broadcast %49 : vector<1x32xf32> to vector<16x32xf32>
    %71 = arith.mulf %69, %70 : vector<16x32xf32>
    %72 = vector.broadcast %51 : vector<1x32xf32> to vector<16x32xf32>
    %73 = arith.addf %71, %72 : vector<16x32xf32>
    %74 = arith.truncf %73 : vector<16x32xf32> to vector<16x32xbf16>
    %c0_33 = arith.constant 0 : index
    %c0_34 = arith.constant 0 : index
    %c0_35 = arith.constant 0 : index
    %75 = vector.load %arg10[%c0_33, %c0_34, %c0_35] : memref<1x32x64xbf16, #tpu.memory_space<vmem>>, vector<1x32x64xbf16>
    %76 = vector.shape_cast %75 : vector<1x32x64xbf16> to vector<32x64xbf16>
    %cst_36 = arith.constant dense<0.000000e+00> : vector<16x64xf32>
    %77 = tpu.matmul %74, %76, %cst_36 {dimension_numbers = #tpu.dot_dimension_numbers<[1], [0], [0], [1], [0, 0, 1, 1], [], []>} : vector<16x32xbf16>, vector<32x64xbf16>, vector<16x64xf32> -> vector<16x64xf32>
    %c0_37 = arith.constant 0 : index
    %c0_38 = arith.constant 0 : index
    %c0_39 = arith.constant 0 : index
    %78 = vector.load %arg11[%c0_37, %c0_38, %c0_39] : memref<1x1x64xf32, #tpu.memory_space<vmem>>, vector<1x1x64xf32>
    %79 = vector.shape_cast %78 : vector<1x1x64xf32> to vector<1x64xf32>
    %80 = vector.broadcast %79 : vector<1x64xf32> to vector<16x64xf32>
    %81 = arith.addf %77, %80 : vector<16x64xf32>
    %cst_40 = arith.constant 0.000000e+00 : f32
    %82 = vector.broadcast %cst_40 : f32 to vector<16x64xf32>
    %83 = arith.maximumf %81, %82 : vector<16x64xf32>
    %84 = arith.truncf %83 : vector<16x64xf32> to vector<16x64xbf16>
    %c0_41 = arith.constant 0 : index
    %c0_42 = arith.constant 0 : index
    %c0_43 = arith.constant 0 : index
    %85 = vector.load %arg12[%c0_41, %c0_42, %c0_43] : memref<1x64x32xbf16, #tpu.memory_space<vmem>>, vector<1x64x32xbf16>
    %86 = vector.shape_cast %85 : vector<1x64x32xbf16> to vector<64x32xbf16>
    %cst_44 = arith.constant dense<0.000000e+00> : vector<16x32xf32>
    %87 = tpu.matmul %84, %86, %cst_44 {dimension_numbers = #tpu.dot_dimension_numbers<[1], [0], [0], [1], [0, 0, 1, 1], [], []>} : vector<16x64xbf16>, vector<64x32xbf16>, vector<16x32xf32> -> vector<16x32xf32>
    %c0_45 = arith.constant 0 : index
    %c0_46 = arith.constant 0 : index
    %c0_47 = arith.constant 0 : index
    %88 = vector.load %arg13[%c0_45, %c0_46, %c0_47] : memref<1x1x32xf32, #tpu.memory_space<vmem>>, vector<1x1x32xf32>
    %89 = vector.shape_cast %88 : vector<1x1x32xf32> to vector<1x32xf32>
    %90 = vector.broadcast %89 : vector<1x32xf32> to vector<16x32xf32>
    %91 = arith.addf %87, %90 : vector<16x32xf32>
    %92 = arith.addf %91, %73 : vector<16x32xf32>
    %c0_48 = arith.constant 0 : index
    %c0_49 = arith.constant 0 : index
    %c0_50 = arith.constant 0 : index
    %93 = vector.load %arg14[%c0_48, %c0_49, %c0_50] : memref<1x1x32xf32, #tpu.memory_space<vmem>>, vector<1x1x32xf32>
    %94 = vector.shape_cast %93 : vector<1x1x32xf32> to vector<1x32xf32>
    %c0_51 = arith.constant 0 : index
    %c0_52 = arith.constant 0 : index
    %c0_53 = arith.constant 0 : index
    %95 = vector.load %arg15[%c0_51, %c0_52, %c0_53] : memref<1x1x32xf32, #tpu.memory_space<vmem>>, vector<1x1x32xf32>
    %96 = vector.shape_cast %95 : vector<1x1x32xf32> to vector<1x32xf32>
    %cst_54 = arith.constant dense<0.000000e+00> : vector<16xf32>
    %97 = vector.multi_reduction <add>, %92, %cst_54 [1] : vector<16x32xf32> to vector<16xf32>
    %98 = vector.shape_cast %97 : vector<16xf32> to vector<16x1xf32>
    %cst_55 = arith.constant 3.200000e+01 : f32
    %99 = vector.broadcast %cst_55 : f32 to vector<16x1xf32>
    %100 = arith.divf %98, %99 : vector<16x1xf32>
    %101 = vector.broadcast %100 : vector<16x1xf32> to vector<16x32xf32>
    %102 = arith.subf %92, %101 : vector<16x32xf32>
    %103 = arith.mulf %102, %102 : vector<16x32xf32>
    %cst_56 = arith.constant dense<0.000000e+00> : vector<16xf32>
    %104 = vector.multi_reduction <add>, %103, %cst_56 [1] : vector<16x32xf32> to vector<16xf32>
    %105 = vector.shape_cast %104 : vector<16xf32> to vector<16x1xf32>
    %cst_57 = arith.constant 3.200000e+01 : f32
    %106 = vector.broadcast %cst_57 : f32 to vector<16x1xf32>
    %107 = arith.divf %105, %106 : vector<16x1xf32>
    %108 = vector.broadcast %100 : vector<16x1xf32> to vector<16x32xf32>
    %109 = arith.subf %92, %108 : vector<16x32xf32>
    %cst_58 = arith.constant 9.99999974E-6 : f32
    %110 = vector.broadcast %cst_58 : f32 to vector<16x1xf32>
    %111 = arith.addf %107, %110 : vector<16x1xf32>
    %112 = math.rsqrt %111 : vector<16x1xf32>
    %113 = vector.broadcast %112 : vector<16x1xf32> to vector<16x32xf32>
    %114 = arith.mulf %109, %113 : vector<16x32xf32>
    %115 = vector.broadcast %94 : vector<1x32xf32> to vector<16x32xf32>
    %116 = arith.mulf %114, %115 : vector<16x32xf32>
    %117 = vector.broadcast %96 : vector<1x32xf32> to vector<16x32xf32>
    %118 = arith.addf %116, %117 : vector<16x32xf32>
    %c0_59 = arith.constant 0 : index
    %c0_60 = arith.constant 0 : index
    %c0_61 = arith.constant 0 : index
    %119 = vector.load %arg4[%c0_59, %c0_60, %c0_61] : memref<2x8x1xf32, #tpu.memory_space<vmem>>, vector<2x8x1xf32>
    %120 = vector.shape_cast %119 : vector<2x8x1xf32> to vector<16x1xf32>
    %cst_62 = arith.constant 0.000000e+00 : f32
    %121 = vector.broadcast %cst_62 : f32 to vector<16x1xf32>
    %122 = arith.cmpf ogt, %120, %121 : vector<16x1xf32>
    %cst_63 = arith.constant 0.000000e+00 : f32
    %123 = vector.shape_cast %122 : vector<16x1xi1> to vector<16x1xi1>
    %124 = vector.broadcast %123 : vector<16x1xi1> to vector<16x32xi1>
    %125 = vector.broadcast %cst_63 : f32 to vector<16x32xf32>
    %126 = arith.select %124, %125, %118 : vector<16x32xi1>, vector<16x32xf32>
    %127 = vector.shape_cast %126 : vector<16x32xf32> to vector<2x8x32xf32>
    %c0_64 = arith.constant 0 : index
    %c0_65 = arith.constant 0 : index
    %c0_66 = arith.constant 0 : index
    %128 = vector.load %arg16[%c0_64, %c0_65, %c0_66] : memref<2x8x32xf32, #tpu.memory_space<vmem>>, vector<2x8x32xf32>
    tpu.vector_store %arg16[%c0_64, %c0_65, %c0_66], %127 {strides = array<i32>} : memref<2x8x32xf32, #tpu.memory_space<vmem>>, vector<2x8x32xf32>,
    %c2_i32 = arith.constant 2 : i32
    %129 = arith.cmpi eq, %arg1, %c2_i32 : i32
    %130 = arith.extui %129 : i1 to i32
    %c0_i32_67 = arith.constant 0 : i32
    %131 = arith.cmpi ne, %130, %c0_i32_67 : i32
    scf.if %131 {
      %c0_68 = arith.constant 0 : index
      %c0_69 = arith.constant 0 : index
      %c0_70 = arith.constant 0 : index
      %132 = vector.load %arg17[%c0_68, %c0_69, %c0_70] : memref<2x8x8xf32, #tpu.memory_space<vmem>>, vector<2x8x8xf32>
      tpu.vector_store %arg17[%c0_68, %c0_69, %c0_70], %34 {strides = array<i32>} : memref<2x8x8xf32, #tpu.memory_space<vmem>>, vector<2x8x8xf32>,
    } else {
    }
    return
  }
  func.func @transform_0(%arg0: i32, %arg1: i32) -> (i32, i32, i32) {
    %c0_i32 = arith.constant 0 : i32
    %c0_i32_0 = arith.constant 0 : i32
    %c0_i32_1 = arith.constant 0 : i32
    return %arg0, %c0_i32, %c0_i32_0 : i32, i32, i32
  }
  func.func @transform_1(%arg0: i32, %arg1: i32) -> (i32, i32, i32) {
    %c0_i32 = arith.constant 0 : i32
    %c0_i32_0 = arith.constant 0 : i32
    %c0_i32_1 = arith.constant 0 : i32
    return %arg0, %c0_i32, %c0_i32_0 : i32, i32, i32
  }
  func.func @transform_2(%arg0: i32, %arg1: i32) -> (i32, i32, i32) {
    %c0_i32 = arith.constant 0 : i32
    %c0_i32_0 = arith.constant 0 : i32
    %c0_i32_1 = arith.constant 0 : i32
    return %arg0, %c0_i32, %c0_i32_0 : i32, i32, i32
  }
  func.func @transform_3(%arg0: i32, %arg1: i32) -> (i32, i32, i32) {
    %c0_i32 = arith.constant 0 : i32
    %c0_i32_0 = arith.constant 0 : i32
    %c0_i32_1 = arith.constant 0 : i32
    return %arg1, %c0_i32, %c0_i32_0 : i32, i32, i32
  }
  func.func @transform_4(%arg0: i32, %arg1: i32) -> (i32, i32, i32) {
    %c0_i32 = arith.constant 0 : i32
    %c0_i32_0 = arith.constant 0 : i32
    %c0_i32_1 = arith.constant 0 : i32
    return %arg1, %c0_i32, %c0_i32_0 : i32, i32, i32
  }
  func.func @transform_5(%arg0: i32, %arg1: i32) -> (i32, i32, i32) {
    %c0_i32 = arith.constant 0 : i32
    %c0_i32_0 = arith.constant 0 : i32
    %c0_i32_1 = arith.constant 0 : i32
    return %arg1, %c0_i32, %c0_i32_0 : i32, i32, i32
  }
  func.func @transform_6(%arg0: i32, %arg1: i32) -> (i32, i32, i32) {
    %c0_i32 = arith.constant 0 : i32
    %c0_i32_0 = arith.constant 0 : i32
    %c0_i32_1 = arith.constant 0 : i32
    return %arg1, %c0_i32, %c0_i32_0 : i32, i32, i32
  }
  func.func @transform_7(%arg0: i32, %arg1: i32) -> (i32, i32, i32) {
    %c0_i32 = arith.constant 0 : i32
    %c0_i32_0 = arith.constant 0 : i32
    %c0_i32_1 = arith.constant 0 : i32
    return %arg1, %c0_i32, %c0_i32_0 : i32, i32, i32
  }
  func.func @transform_8(%arg0: i32, %arg1: i32) -> (i32, i32, i32) {
    %c0_i32 = arith.constant 0 : i32
    %c0_i32_0 = arith.constant 0 : i32
    %c0_i32_1 = arith.constant 0 : i32
    return %arg1, %c0_i32, %c0_i32_0 : i32, i32, i32
  }
  func.func @transform_9(%arg0: i32, %arg1: i32) -> (i32, i32, i32) {
    %c0_i32 = arith.constant 0 : i32
    %c0_i32_0 = arith.constant 0 : i32
    %c0_i32_1 = arith.constant 0 : i32
    return %arg1, %c0_i32, %c0_i32_0 : i32, i32, i32
  }
  func.func @transform_10(%arg0: i32, %arg1: i32) -> (i32, i32, i32) {
    %c0_i32 = arith.constant 0 : i32
    %c0_i32_0 = arith.constant 0 : i32
    %c0_i32_1 = arith.constant 0 : i32
    return %arg1, %c0_i32, %c0_i32_0 : i32, i32, i32
  }
  func.func @transform_11(%arg0: i32, %arg1: i32) -> (i32, i32, i32) {
    %c0_i32 = arith.constant 0 : i32
    %c0_i32_0 = arith.constant 0 : i32
    %c0_i32_1 = arith.constant 0 : i32
    return %arg1, %c0_i32, %c0_i32_0 : i32, i32, i32
  }
  func.func @transform_12(%arg0: i32, %arg1: i32) -> (i32, i32, i32) {
    %c0_i32 = arith.constant 0 : i32
    %c0_i32_0 = arith.constant 0 : i32
    %c0_i32_1 = arith.constant 0 : i32
    return %arg1, %c0_i32, %c0_i32_0 : i32, i32, i32
  }
  func.func @transform_13(%arg0: i32, %arg1: i32) -> (i32, i32, i32) {
    %c0_i32 = arith.constant 0 : i32
    %c0_i32_0 = arith.constant 0 : i32
    %c0_i32_1 = arith.constant 0 : i32
    return %arg1, %c0_i32, %c0_i32_0 : i32, i32, i32
  }
  func.func @transform_14(%arg0: i32, %arg1: i32) -> (i32, i32, i32) {
    %c0_i32 = arith.constant 0 : i32
    %c0_i32_0 = arith.constant 0 : i32
    %c0_i32_1 = arith.constant 0 : i32
    return %arg0, %c0_i32, %c0_i32_0 : i32, i32, i32
  }
  func.func @transform_15(%arg0: i32, %arg1: i32) -> (i32, i32, i32) {
    %c0_i32 = arith.constant 0 : i32
    %c0_i32_0 = arith.constant 0 : i32
    %c0_i32_1 = arith.constant 0 : i32
    return %arg0, %c0_i32, %c0_i32_0 : i32, i32, i32
  }
}

</mosaic_0001>

<bundles_post_ra>
// kernel: tpu_custom_call.1
= control target key start
LH: loop header
LB: loop body
LE: loop exit
PB: predicated region body
PF: predicated region fallthrough
CT: control target
= control target key end

     0   :  { %s2374_s0 = inlined_call_operand.vmem [shape: f32[2,8,32], index: 0, kind: input, shape index: {}]   ;;  %s2375_s1 = inlined_call_operand.hbm [shape: f32[2,1,8], index: 1, kind: input, shape index: {}]   ;;  %s2376_s2 = inlined_call_operand.vmem [shape: f32[2,8,1], index: 2, kind: input, shape index: {}]   ;;  %s2377_s3 = inlined_call_operand.vmem [shape: bf16[3,32,96], index: 3, kind: input, shape index: {}]   ;;  %s2378_s4 = inlined_call_operand.vmem [shape: bf16[3,32,32], index: 4, kind: input, shape index: {}]   ;;  %s2379_s5 = inlined_call_operand.vmem [shape: f32[3,1,32], index: 5, kind: input, shape index: {}]   ;;  %s2380_s6 = inlined_call_operand.vmem [shape: f32[3,1,32], index: 6, kind: input, shape index: {}]   ;;  %s2381_s7 = inlined_call_operand.hbm [shape: f32[3,1,32], index: 7, kind: input, shape index: {}]   ;;  %s2382_s8 = inlined_call_operand.vmem [shape: bf16[3,32,64], index: 8, kind: input, shape index: {}]   ;;  %s2383_s9 = inlined_call_operand.vmem [shape: f32[3,1,64], index: 9, kind: input, shape index: {}]   ;;  %s2384_s10 = inlined_call_operand.vmem [shape: bf16[3,64,32], index: 10, kind: input, shape index: {}]   ;;  %s2385_s11 = inlined_call_operand.hbm [shape: f32[3,1,32], index: 11, kind: input, shape index: {}]   ;;  %s2386_s12 = inlined_call_operand.vmem [shape: f32[3,1,32], index: 12, kind: input, shape index: {}]   ;;  %s2387_s13 = inlined_call_operand.hbm [shape: f32[3,1,32], index: 13, kind: input, shape index: {}]   ;;  %s2388_s14 = inlined_call_operand.hbm [shape: f32[2,8,32], index: 14, kind: output, shape index: {0}]   ;;  %s2389_s15 = inlined_call_operand.hbm [shape: f32[2,8,8], index: 15, kind: output, shape index: {1}]  }
   0x1   :  { %2395 = sst [smem:[#allocation22_spill]] %s2374_s0 }
   0x2   :  { %2396 = sst [smem:[#allocation23_spill]] %s2375_s1 }
   0x3   :  { %2397 = sst [smem:[#allocation24_spill]] %s2376_s2 }
   0x4   :  { %2398 = sst [smem:[#allocation25_spill]] %s2377_s3 }
   0x5   :  { %2399 = sst [smem:[#allocation26_spill]] %s2378_s4 }
   0x6   :  { %2400 = sst [smem:[#allocation27_spill]] %s2381_s7 }
   0x7   :  { %2401 = sst [smem:[#allocation28_spill]] %s2383_s9 }
   0x8   :  { %2402 = sst [smem:[#allocation29_spill]] %s2384_s10 }
   0x9   :  { %2403 = sst [smem:[#allocation30_spill]] %s2385_s11 }
   0xa   :  { %2404 = sst [smem:[#allocation31_spill]] %s2386_s12 }
   0xb   :  { %2405 = sst [smem:[#allocation32_spill]] %s2388_s14 }
   0xc   :  { %2406 = sst [smem:[#allocation33_spill]] %s2389_s15 }
   0xd   :  { %21 = vsyncpa [#allocation3], 0 }
   0xe   :  { %22 = vsyncpa [#allocation6], 0 }
   0xf   :  { %24 = vsyncpa [#allocation6 + $0x1], 0 }
  0x10   :  { %25 = vsyncpa [#allocation9], 0 }
  0x11   :  { %27 = vsyncpa [#allocation9 + $0x1], 0 }
  0x12   :  { %28 = vsyncpa [#allocation4], 0 }
  0x13   :  { %29 = vsyncpa [#allocation12], 0  ;;  %s2060_s18 = smov 0   ;;  %s2062_s19 = smov 0  }
  0x14   :  { %s2064_s20 = smov 0   ;;  %s2066_s21 = smov 0  }
  0x15   :  { %s2068_s22 = smov 0   ;;  %s2070_s23 = smov 0  }
  0x16 LB: > { %2407 = sst [smem:[#allocation18_spill]] %s1955_s20  ;;  %s44_s24 = sadd.s32 1, %s1963_s22  ;;  %s1967_s23 = sphi %s2070_s23, %s35_s23   ;;  %s1963_s22 = sphi %s2068_s22, %s2440_s22   ;;  %s1959_s21 = sphi %s2066_s21, %s2439_s21   ;;  %s1955_s20 = sphi %s2064_s20, %s2435_s20   ;;  %s1951_s19 = sphi %s2062_s19, %s2438_s19   ;;  %s1947_s18 = sphi %s2060_s18, %s2437_s18  }
  0x17   : > { %2408 = sst [smem:[#allocation19_spill]] %s1967_s23  ;;  %s236_s25 = sadd.s32 1, %s1955_s20 }
  0x18   : > { %p45_p0 = scmp.ge.s32.totalorder %s44_s24, 3  ;;  %p243_p1 = scmp.ne.s32.totalorder %s1955_s20, %s1951_s19 }
  0x19   : > { %p244_p2 = scmp.eq.s32.totalorder %s1967_s23, 0  ;;  %p249_p3 = scmp.ne.s32.totalorder %s1951_s19, %s1947_s18 }
  0x1a   : > { %s2442_s24 = smov (%p45_p0, %s44_s24), 0  ;;  %p1632_p5 = scmp.lt.s32.totalorder %s1967_s23, 3 }
  0x1b   : > { %2409 = sst [smem:[#allocation20_spill]] %s2442_s24  ;;  %p2099_p4 = por %p244_p2, %p243_p1 }
  0x1c   : > { %s233_s27 = ssub.s32 %s1963_s22, %s2442_s24  ;;  %s543_s28 = sand.u32 1, %s1967_s23  }
  0x1d   : > { %p234_p6 = scmp.eq.s32.totalorder %s233_s27, 0  ;;  %s2108_s29 = sand.u32 1, %s1955_s20  }
  0x1e   : > { %s2412_s7 = sld [smem:[#allocation27_spill]]  ;;  %s546_s2 = scalar_lea.vmem [#allocation5], %s2108_s29 }
  0x1f   : > { %s2111_s30 = scalar_select %p234_p6, %s1955_s20, %s236_s25  }
  0x20   : > { %s553_s0 = sshll.u32 %s546_s2, 4  ;;  %p2120_p7 = pnand %p1632_p5, %p2099_p4  ;;  %s554_s0 = int_to_ptr.vmem [resolvable:$true] %s553_s0 }
  0x21   : > { %2411 = sst [smem:[#allocation21_spill]] %s2111_s30  ;;  %s2125_s24 = sadd.s32 4294967295, %s1967_s23  }
  0x22   : > { %p250_p8 = scmp.eq.s32.totalorder %s2125_s24, 0  ;;  %s544_s25 = scalar_lea.sflag [#allocation6], %s543_s28 }
  0x23   : > { %p1514_p10 = scmp.ge.s32.totalorder %s1967_s23, 1  ;;  %p468_p11 = scmp.lt.s32.totalorder %s1967_s23, 4 }
  0x24   : > { %s549_s15 = scalar_lea.hbm %s2412_s7, %s1963_s22  ;;  %p2135_p9 = por %p250_p8, %p249_p3 }
  0x25   : > { %s551_s14 = sshll.u32 %s549_s15, 4  ;;  %s2415_s1 = sld [smem:[#allocation23_spill]]  ;;  %s552_s14 = int_to_ptr.hbm [resolvable:$true] %s551_s14 }
  0x26   : > { %1624 = dma.hbm_to_vmem [thread:$0]  (!%p2120_p7), %s552_s14, 16, %s554_s0, %s544_s25  }
  0x27   : > { %p2144_p12 = pnand %p1514_p10, %p468_p11  ;;  %s1969_s0 = smov [#allocation2]  }
  0x28   : > { %s492_s14 = sshll.u32 %s1969_s0, 4  ;;  %s2417_s11 = sld [smem:[#allocation30_spill]]  ;;  %s493_s14 = int_to_ptr.vmem [resolvable:$true] %s492_s14 }
  0x29   : > { %p1617_p13 = pneg %p2144_p12  ;;  %s1970_s30 = smov 16  }
  0x2a   : > { %s1971_s20 = smov 1   ;;  %s611_s12 = scalar_lea.hbm %s2387_s13, %s1963_s22 }
  0x2b   : > { %s490_s16 = sshll.u32 %s2415_s1, 4  ;;  %p1618_p0 = pnand %p1617_p13, %p250_p8  ;;  %s491_s16 = int_to_ptr.hbm [resolvable:$true] %s490_s16 }
  0x2c   : > { %s585_s1 = scalar_lea.vmem [#allocation7], %s2108_s29  ;;  %s613_s10 = sshll.u32 %s611_s12, 4  ;;  %s614_s10 = int_to_ptr.hbm [resolvable:$true] %s613_s10 }
  0x2d   : > { %s592_s7 = sshll.u32 %s585_s1, 4  ;;  %s608_s9 = scalar_lea.vmem [#allocation8], %s2108_s29  ;;  %s593_s7 = int_to_ptr.vmem [resolvable:$true] %s592_s7 }
  0x2e   : > { %s588_s15 = scalar_lea.hbm %s2417_s11, %s1963_s22  ;;  %s615_s18 = sshll.u32 %s608_s9, 4  ;;  %s616_s18 = int_to_ptr.vmem [resolvable:$true] %s615_s18 }
  0x2f   : > { %s590_s26 = sshll.u32 %s588_s15, 4  ;;  %s606_s28 = scalar_lea.sflag [#allocation9], %s2108_s29  ;;  %s591_s26 = int_to_ptr.hbm [resolvable:$true] %s590_s26 }
  0x30   : > { %1620 = dma.hbm_to_vmem [thread:$0]  (!%p1618_p0), %s491_s16, 32, %s493_s14, [#allocation3], %s1970_s30, %s1970_s30, %s1971_s20  }
  0x31   : > { %1627 = dma.hbm_to_vmem [thread:$0]  (!%p2120_p7), %s591_s26, 16, %s593_s7, %s544_s25  }
  0x32   : > { %1630 = dma.hbm_to_vmem [thread:$0]  (!%p2120_p7), %s614_s10, 16, %s616_s18, %s606_s28  }
  0x33   : > { %624 = sbr.rel (%p2144_p12) target bundleno = 1856 (0x740), region = 76 }
  0x38   : > { %1926 = dma.done.wait (%p250_p8), [#allocation3], 32  }
  0x39   : > { %1928 = vsyncadd (%p250_p8), [#allocation3], 4294967264  ;;  %s631_s1 = sand.u32 1, %s2125_s24   ;;  %s2175_s7 = sand.u32 1, %s1951_s19  }
  0x3a   : > { %s632_s9 = scalar_lea.sflag [#allocation6], %s631_s1 }
  0x3b   : > { %1930 = dma.done.wait (%p2135_p9), %s632_s9, 32  }
  0x3c   : > { %1932 = vsyncadd (%p2135_p9), %s632_s9, 4294967264  ;;  %s650_s20 = scalar_lea.sflag [#allocation9], %s2175_s7 }
  0x3d   : > { %1934 = dma.done.wait (%p2135_p9), %s650_s20, 16  }
  0x3e   : > { %1936 = vsyncadd (%p2135_p9), %s650_s20, 4294967280  ;;  %p757_p1 = scmp.lt.s32.totalorder %s1959_s21, 2  ;;  %s2418_s3 = sld [smem:[#allocation25_spill]] }
  0x3f   : > { %s2419_s4 = sld [smem:[#allocation26_spill]]  ;;  %p1529_p2 = scmp.ne.s32.totalorder %s1959_s21, 0 }
  0x40   : > { %s2191_s29 = scalar_select %p757_p1, %s1959_s21, 2 }
  0x41   : > { %s2420_s10 = sld [smem:[#allocation28_spill]] }
  0x42   : > { %s1585_s30 = sshll.u32 %s2191_s29, 4  ;;  %s772_s1 = scalar_lea.vmem %s2380_s6, %s2191_s29 }
  0x43   : > { %s2213_s23 = scalar_lea.vmem %s2382_s8, %s1585_s30  ;;  %s1588_s17 = sshll.u32 %s2191_s29, 5 }
  0x44   : > { %s761_s2 = scalar_lea.vmem %s2418_s3, %s1585_s30  ;;  %s2421_s3 = sld [smem:[#allocation29_spill]] }
  0x45   : > { %s2204_s0 = scalar_lea.vmem %s2419_s4, %s1585_s30  ;;  %s2422_s11 = sld [smem:[#allocation31_spill]] }
  0x46   : > { %s2423_s9 = sld [smem:[#allocation22_spill]] (!%p1529_p2) }
  0x47   : > { %s780_s12 = scalar_lea.vmem %s2420_s10, %s2191_s29  ;;  %795 = sbr.rel (%p1529_p2) target bundleno = 79 (0x4f), region = 96 }
  0x4a   : > { %s2223_s15 = scalar_lea.vmem %s2421_s3, %s1588_s17 }
  0x4b   : > { %s788_s18 = scalar_lea.vmem %s2422_s11, %s2191_s29 }
  0x4c   : > { %v796_v0 = vld [vmem:[%s2423_s9] sm:$0xff]  ;;  %vm798_vm0 = vcmask 261120   ;;  %v797_v1 = vld [vmem:[%s2423_s9 + $0x8] sm:$0xff] }
  0x4d   : > { %799 = vst.msk [vmem:[#allocation10] sm:$0xff] %vm798_vm0, %v796_v0 }
  0x4e   : > { %800 = vst.msk [vmem:[#allocation10 + $0x8] sm:$0xff] %vm798_vm0, %v797_v1 }
  0x4f PF: > { %v1590_v2 = vld [vmem:[%s761_s2 + $0x8] sm:$0xff]  ;;  %v1589_v3 = vld [vmem:[%s761_s2] sm:$0xff]  ;;  %vm820_vm1 = vcmask 261120   ;;  %s1972_s3 = smov 96   ;;  %v1973_v19 = vmov 0   ;;  %vm900_vm4 = vcmask 64512   ;;  %s2424_s2 = scalar_lea.vmem %s2379_s5, %s2191_s29 }
  0x50   : > { %830 = vmatpush.bf16.msra.mxu0 %v1590_v2  ;;  %1697 = vset.pattern.permute.xlu1 %v1973_v19  ;;  %v888_v20 = vld [vmem:[#allocation2] sm:$0x1]  ;;  %v889_v23 = vld [vmem:[#allocation2 + $0x1] sm:$0x1]  ;;  %s1974_s4 = smov 64   ;;  %vm930_vm7 = vcmask 1043456  }
  0x51   : > { %1698 = vset.pattern.permute.xlu2 %v1973_v19  ;;  %1699 = vset.pattern.permute.xlu0 %v1973_v19  ;;  %vm890_vm2 = vcmp.gt.f32.partialorder %v888_v20, 0.0  ;;  %vm891_vm5 = vcmp.gt.f32.partialorder %v889_v23, 0.0  ;;  %v1592_v56 = vld [vmem:[%s2204_s0 + $0x8] sm:$0xff]  ;;  %v1591_v57 = vld [vmem:[%s2204_s0] sm:$0xff]  ;;  %s2425_s27 = scalar_lea.vmem [#allocation5], %s2175_s7  ;;  %vm1148_vm15 = vcmask 523264  }
  0x52   : > { %v892_v21 = vsel %vm890_vm2, 1, %v1973_v19  ;;  %v893_v27 = vsel %vm891_vm5, 1, %v1973_v19  ;;  %v1700_v63 = vld [vmem:[%s2424_s2] ss:$0 sm:$0xff]  ;;  %s2427_s14 = scalar_lea.vmem [#allocation7], %s2175_s7  ;;  %s2428_s26 = sld [smem:[#allocation24_spill]] }
  0x53   : > { %v894_v22 = vperm.slane %v892_v21, 0  ;;  %v895_v29 = vperm.slane %v893_v27, 0  ;;  %p1578_p3 = scmp.ne.s32.totalorder %s1959_s21, 2 }
  0x54   : > { %v2236_v4 = vld [vmem:[#allocation10] sm:$0xff]  ;;  %831 = vmatpush.bf16.msra.mxu0 %v1589_v3 }
  0x55   : > { %v2238_v5 = vld [vmem:[#allocation10 + $0x8] sm:$0xff]  ;;  %vm896_vm3 = vcmp.eq.s32.totalorder %v894_v22, 1  ;;  %vm897_vm6 = vcmp.eq.s32.totalorder %v895_v29, 1 }
  0x56   : > { %v803_v6 = vpack.c.bf16 %v2238_v5, %v2236_v4 }
  0x58   : > { %1538 = vmatmul.msk.bf16.vlgmr.msra.gmra.mxu0 %vm820_vm1, %v803_v6 }
  0x59   : > { %998 = vmatpush.bf16.msrb.mxu0 %v1592_v56 }
  0x5d   : > { %999 = vmatpush.bf16.msrb.mxu0 %v1591_v57 }
  0xd5   : > { %v833_v7 = vpop.f32.mrf.mxu0 }
  0xd6   : > { %v838_v8 = vpack.c.bf16 %v833_v7, %v833_v7 }
  0xd8   : > { %v841_v9 = vunpack.c.l.b16 %v838_v8 }
  0xda   : > { %v842_v10 = vpack.c.b16 %v841_v9, %v841_v9 }
  0xdc   : > { %843 = vrot.lane.b32.xlu0 %v842_v10, %s1972_s3 }
  0xdd   : > { %v835_v11 = vpop.f32.mrf.mxu0 }
  0xde   : > { %v839_v12 = vpack.c.bf16 %v835_v11, %v835_v11 }
  0xe0   : > { %v865_v13 = vunpack.c.l.b16 %v839_v12 }
  0xe2   : > { %v866_v14 = vpack.c.b16 %v865_v13, %v865_v13 }
  0xe4   : > { %867 = vrot.lane.b32.xlu0 %v866_v14, %s1972_s3 }
 0x14e   : > { %v844_v15 = vpop.permute.xlu0 %843 }
 0x14f   : > { %v849_v16 = vsel %vm820_vm1, %v844_v15, 0 }
 0x150   : > { %858 = vmatpush.bf16.xpose.msra.mxu1 %v849_v16 }
 0x156   : > { %v868_v17 = vpop.permute.xlu0 %867 }
 0x157   : > { %1539 = vmatmul.msk.bf16.vlgmr.msra.gmra.mxu1 %vm820_vm1, %v838_v8  ;;  %v873_v18 = vsel %vm820_vm1, %v868_v17, 0 }
 0x158   : > { %882 = vmatpush.bf16.xpose.msra.mxu2 %v873_v18 }
 0x15f   : > { %1540 = vmatmul.msk.bf16.vlgmr.msra.gmra.mxu2 %vm820_vm1, %v839_v12 }
 0x1d4   : > { %v860_v24 = vpop.f32.mrf.mxu1 }
 0x1d5   : > { %v898_v25 = vsel %vm896_vm3, -1e+30, %v860_v24 }
 0x1d6   : > { %v901_v26 = vsel %vm900_vm4, %v898_v25, -inf }
 0x1d7   : > { %902 = vmax.xlane.f32.xlu1 %v901_v26  ;;  %v1594_v26 = vld [vmem:[%s2213_s23 + $0x8] sm:$0xff] }
 0x1d8   : > { %1101 = vmatpush.bf16.msrb.mxu1 %v1594_v26 }
 0x1dc   : > { %v862_v28 = vpop.f32.mrf.mxu1 }
 0x1dd   : > { %v1593_v28 = vld [vmem:[%s2213_s23] sm:$0xff] }
 0x1de   : > { %1102 = vmatpush.bf16.msrb.mxu1 %v1593_v28 }
 0x1e2   : > { %v884_v30 = vpop.f32.mrf.mxu2 }
 0x1e3   : > { %v899_v31 = vsel %vm897_vm6, -1e+30, %v884_v30 }
 0x1e4   : > { %v904_v32 = vsel %vm900_vm4, %v899_v31, -inf }
 0x1e5   : > { %905 = vmax.xlane.f32.xlu1 %v904_v32 }
 0x1ea   : > { %v886_v33 = vpop.f32.mrf.mxu2 }
 0x1fe   : > { %947 = vrot.lane.b32.xlu1 %v866_v14, %s1974_s4 }
 0x24a   : > { %v903_v34 = vpop.xlane.xlu1 %902 }
 0x24b   : > { %v907_v35 = vsub.f32 %v898_v25, %v903_v34 }
 0x24d   : > { %v909_v36 = vmul.f32 1.442695, %v907_v35 }
 0x24f   : > { %1707 = vpow2.f32 %v909_v36 }
 0x255   : > { %v1708_v37 = vpop.eup %1707 }
 0x256   : > { %v913_v38 = vsel %vm900_vm4, %v1708_v37, 0.0 }
 0x257   : > { %914 = vadd.xlane.f32.xlu2 %v913_v38 }
 0x258   : > { %v906_v39 = vpop.xlane.xlu1 %905 }
 0x259   : > { %v908_v40 = vsub.f32 %v899_v31, %v906_v39  ;;  %v1598_v31 = vld [vmem:[%s2223_s15 + $0x18] sm:$0xff] }
 0x25a   : > { %1156 = vmatpush.bf16.msrb.mxu2 %v1598_v31 }
 0x25b   : > { %v911_v41 = vmul.f32 1.442695, %v908_v40 }
 0x25d   : > { %1709 = vpow2.f32 %v911_v41 }
 0x263   : > { %v1710_v42 = vpop.eup %1709 }
 0x264   : > { %v916_v43 = vsel %vm900_vm4, %v1710_v42, 0.0 }
 0x265   : > { %917 = vadd.xlane.f32.xlu0 %v916_v43 }
 0x26f   : > { %925 = vrot.lane.b32.xlu2 %v842_v10, %s1974_s4  ;;  %v1975_v10 = vmov 32.0   ;;  %s2430_s4 = scalar_lea.vmem [#allocation8], %s2175_s7 }
 0x270   : > { %v948_v46 = vpop.permute.xlu1 %947 }
 0x271   : > { %v953_v50 = vsel %vm930_vm7, %v948_v46, 0 }
 0x2ca   : > { %v915_v44 = vpop.xlane.xlu2 %914 }
 0x2cb   : > { %1711 = vrcp.f32 %v915_v44 }
 0x2d1   : > { %v1712_v45 = vpop.eup %1711 }
 0x2d2   : > { %v926_v47 = vpop.permute.xlu2 %925  ;;  %v2256_v48 = vmul.f32 %v1712_v45, %v1708_v37 }
 0x2d3   : > { %v932_v49 = vsel %vm930_vm7, %v926_v47, 0 }
 0x2d4   : > { %941 = vmatpush.bf16.msra.mxu3 %v932_v49  ;;  %v923_v51 = vpack.c.bf16 %v2256_v48, %v2256_v48  ;;  %v1701_v49 = vld [vmem:[%s772_s1] ss:$0 sm:$0xff] }
 0x2d7   : > { %1541 = vmatmul.msk.bf16.vlgmr.msra.gmra.mxu3 %vm900_vm4, %v923_v51 }
 0x2d8   : > { %962 = vmatpush.bf16.msrb.mxu3 %v953_v50  ;;  %v918_v52 = vpop.xlane.xlu0 %917 }
 0x2d9   : > { %1713 = vrcp.f32 %v918_v52 }
 0x2da   : > { %1715 = vrcp.f32 %v1975_v10 }
 0x2df   : > { %v1714_v53 = vpop.eup %1713 }
 0x2e0   : > { %v2261_v54 = vmul.f32 %v1714_v53, %v1710_v42  ;;  %v1716_v11 = vpop.eup %1715 }
 0x2e1   : > { %v1017_v12 = vmul.f32 32.0, %v1716_v11  ;;  %vm1021_vm8 = vweird.f32 %v1716_v11 }
 0x2e2   : > { %v924_v55 = vpack.c.bf16 %v2261_v54, %v2261_v54 }
 0x2e3   : > { %v1018_v13 = vsub.f32 1.0, %v1017_v12 }
 0x2e5   : > { %v1019_v14 = vmul.f32 %v1716_v11, %v1018_v13 }
 0x2e7   : > { %1542 = vmatmul.msk.bf16.vlgmr.msrb.gmra.mxu3 %vm900_vm4, %v924_v55  ;;  %v1020_v15 = vadd.f32 %v1716_v11, %v1019_v14  ;;  %v1702_v55 = vld [vmem:[%s2425_s27] ss:$0 sm:$0xff] }
 0x35a   : > { %v943_v58 = vpop.f32.mrf.mxu3 }
 0x362   : > { %v945_v59 = vpop.f32.mrf.mxu3 }
 0x36a   : > { %v964_v60 = vpop.f32.mrf.mxu3 }
 0x36b   : > { %v968_v61 = vpack.c.bf16 %v964_v60, %v943_v58  ;;  %v1597_v60 = vld [vmem:[%s2223_s15 + $0x10] sm:$0xff] }
 0x36c   : > { %1157 = vmatpush.bf16.msrb.mxu2 %v1597_v60 }
 0x36d   : > { %1551 = vmatmul.msk.bf16.vlgmr.msrb.gmra.mxu0 %vm820_vm1, %v968_v61  ;;  %v1596_v61 = vld [vmem:[%s2223_s15 + $0x8] sm:$0xff] }
 0x370   : > { %1158 = vmatpush.bf16.msrb.mxu2 %v1596_v61 }
 0x372   : > { %v966_v62 = vpop.f32.mrf.mxu3 }
 0x373   : > { %v1595_v62 = vld [vmem:[%s2223_s15] sm:$0xff] }
 0x374   : > { %1159 = vmatpush.bf16.msrb.mxu2 %v1595_v62 }
 0x3ea   : > { %v1001_v0 = vpop.f32.mrf.mxu0 }
 0x3eb   : > { %v1002_v1 = vadd.f32 %v1700_v63, %v1001_v0  ;;  %v1703_v0 = vld [vmem:[%s780_s12] ss:$0 sm:$0xff] }
 0x3ed   : > { %v1006_v2 = vadd.f32 %v1002_v1, %v2236_v4  ;;  %v2278_v4 = vsel %vm1021_vm8, %v1716_v11, %v1020_v15 }
 0x3ef   : > { %v1010_v3 = vsel %vm820_vm1, %v1006_v2, 0.0 }
 0x3f0   : > { %1011 = vadd.xlane.f32.xlu2 %v1010_v3 }
 0x3f2   : > { %v1003_v6 = vpop.f32.mrf.mxu0 }
 0x3f3   : > { %v1004_v7 = vadd.f32 %v1700_v63, %v1003_v6 }
 0x3f5   : > { %v1007_v8 = vadd.f32 %v1004_v7, %v2238_v5 }
 0x3f7   : > { %v1013_v9 = vsel %vm820_vm1, %v1007_v8, 0.0 }
 0x3f8   : > { %1014 = vadd.xlane.f32.xlu1 %v1013_v9  ;;  %v1704_v9 = vld [vmem:[%s2427_s14] ss:$0 sm:$0xff] }
 0x463   : > { %v1012_v16 = vpop.xlane.xlu2 %1011 }
 0x464   : > { %v1023_v17 = vmul.f32 %v2278_v4, %v1012_v16 }
 0x466   : > { %v1025_v18 = vsub.f32 %v1006_v2, %v1023_v17 }
 0x468   : > { %v1027_v5 = vmul.f32 %v1025_v18, %v1025_v18 }
 0x46a   : > { %v1029_v20 = vsel %vm820_vm1, %v1027_v5, 0.0 }
 0x46b   : > { %v1015_v21 = vpop.xlane.xlu1 %1014  ;;  %1030 = vadd.xlane.f32.xlu0 %v1029_v20 }
 0x46c   : > { %v1024_v22 = vmul.f32 %v2278_v4, %v1015_v21 }
 0x46e   : > { %v1026_v23 = vsub.f32 %v1007_v8, %v1024_v22 }
 0x470   : > { %v1028_v24 = vmul.f32 %v1026_v23, %v1026_v23 }
 0x472   : > { %v1032_v25 = vsel %vm820_vm1, %v1028_v24, 0.0 }
 0x473   : > { %1033 = vadd.xlane.f32.xlu0 %v1032_v25 }
 0x4de   : > { %v1031_v27 = vpop.xlane.xlu0 %1030 }
 0x4df   : > { %v1035_v29 = vmul.f32 %v1031_v27, %v2278_v4 }
 0x4e1   : > { %v1037_v30 = vadd.f32 1e-05, %v1035_v29 }
 0x4e3   : > { %1717 = vrsqrt.f32 %v1037_v30  ;;  %vm1045_vm10 = vweird.f32 %v1037_v30 }
 0x4e6   : > { %v1034_v32 = vpop.xlane.xlu0 %1033 }
 0x4e7   : > { %v1036_v33 = vmul.f32 %v1034_v32, %v2278_v4 }
 0x4e9   : > { %v1718_v34 = vpop.eup %1717  ;;  %v1038_v35 = vadd.f32 1e-05, %v1036_v33 }
 0x4ea   : > { %v1040_v36 = vmul.f32 %v1718_v34, %v1037_v30  ;;  %vm1046_vm9 = vweird.f32 %v1718_v34  ;;  %v1225_v30 = vld [vmem:[%s2428_s26 + $0x8] sm:$0xff] }
 0x4eb   : > { %1719 = vrsqrt.f32 %v1038_v35  ;;  %vm1047_vm11 = vmor %vm1045_vm10, %vm1046_vm9  ;;  %vm1055_vm13 = vweird.f32 %v1038_v35  ;;  %vm1227_vm2 = vcmp.gt.f32.partialorder %v1225_v30, 0.0 }
 0x4ec   : > { %v1041_v37 = vmul.f32 %v1718_v34, %v1040_v36  ;;  %v1229_v31 = vsel %vm1227_vm2, 1, %v1973_v19 }
 0x4ee   : > { %v1042_v38 = vmul.f32 0.5, %v1041_v37 }
 0x4f0   : > { %v1043_v39 = vsub.f32 1.5, %v1042_v38 }
 0x4f1   : > { %v1720_v40 = vpop.eup %1719 }
 0x4f2   : > { %v1044_v41 = vmul.f32 %v1718_v34, %v1043_v39  ;;  %v1050_v42 = vmul.f32 %v1720_v40, %v1038_v35  ;;  %vm1056_vm12 = vweird.f32 %v1720_v40 }
 0x4f3   : > { %vm1057_vm14 = vmor %vm1055_vm13, %vm1056_vm12 }
 0x4f4   : > { %v1051_v43 = vmul.f32 %v1720_v40, %v1050_v42  ;;  %v1048_v44 = vsel %vm1047_vm11, %v1718_v34, %v1044_v41 }
 0x4f5   : > { %v1059_v47 = vmul.f32 %v1048_v44, %v1025_v18  ;;  %v1224_v18 = vld [vmem:[%s2428_s26] sm:$0xff] }
 0x4f6   : > { %v1052_v45 = vmul.f32 0.5, %v1051_v43  ;;  %vm1226_vm0 = vcmp.gt.f32.partialorder %v1224_v18, 0.0 }
 0x4f7   : > { %v1064_v53 = vmul.f32 %v1701_v49, %v1059_v47  ;;  %v1228_v5 = vsel %vm1226_vm0, 1, %v1973_v19  ;;  %v1706_v47 = vld [vmem:[%s2430_s4] ss:$0 sm:$0xff] }
 0x4f8   : > { %v1053_v46 = vsub.f32 1.5, %v1052_v45  ;;  %1231 = vperm.xlu1 %1697, %v1228_v5   ;;  %v1705_v45 = vld [vmem:[%s788_s18] ss:$0 sm:$0xff] }
 0x4f9   : > { %v1069_v57 = vadd.f32 %v1702_v55, %v1064_v53 }
 0x4fa   : > { %v1054_v50 = vmul.f32 %v1720_v40, %v1053_v46 }
 0x4fc   : > { %v1058_v51 = vsel %vm1057_vm14, %v1720_v40, %v1054_v50 }
 0x4fd   : > { %v1060_v52 = vmul.f32 %v1058_v51, %v1026_v23 }
 0x4ff   : > { %v1065_v56 = vmul.f32 %v1701_v49, %v1060_v52 }
 0x501   : > { %v1070_v58 = vadd.f32 %v1702_v55, %v1065_v56 }
 0x503   : > { %v1071_v59 = vpack.c.bf16 %v1070_v58, %v1069_v57 }
 0x505   : > { %1560 = vmatmul.msk.bf16.vlgmr.msrb.gmra.mxu1 %vm820_vm1, %v1071_v59 }
 0x56a   : > { %v1232_v49 = vpop.permute.xlu1 %1231 }
 0x56b   : > { %vm1236_vm8 = vcmp.eq.s32.totalorder %v1232_v49, 1 }
 0x582   : > { %v1104_v63 = vpop.f32.mrf.mxu1 }
 0x583   : > { %v1105_v1 = vadd.f32 %v1703_v0, %v1104_v63 }
 0x585   : > { %v1109_v6 = vmax.f32 %v1105_v1, 0.0 }
 0x58a   : > { %v1106_v2 = vpop.f32.mrf.mxu1 }
 0x58b   : > { %v1107_v3 = vadd.f32 %v1703_v0, %v1106_v2 }
 0x58d   : > { %v1110_v7 = vmax.f32 %v1107_v3, 0.0 }
 0x58f   : > { %v1111_v8 = vpack.c.bf16 %v1110_v7, %v1109_v6 }
 0x591   : > { %1577 = vmatmul.msk.bf16.vlgmr.msrb.gmra.mxu2 %vm1148_vm15, %v1111_v8 }
 0x614   : > { %v1161_v10 = vpop.f32.mrf.mxu2 }
 0x615   : > { %v1162_v11 = vadd.f32 %v1704_v9, %v1161_v10 }
 0x617   : > { %v1166_v12 = vadd.f32 %v1162_v11, %v1069_v57 }
 0x619   : > { %v1170_v13 = vsel %vm820_vm1, %v1166_v12, 0.0 }
 0x61a   : > { %1171 = vadd.xlane.f32.xlu2 %v1170_v13 }
 0x61c   : > { %v1163_v14 = vpop.f32.mrf.mxu2 }
 0x61d   : > { %v1164_v15 = vadd.f32 %v1704_v9, %v1163_v14 }
 0x61f   : > { %v1167_v16 = vadd.f32 %v1164_v15, %v1070_v58 }
 0x621   : > { %v1173_v17 = vsel %vm820_vm1, %v1167_v16, 0.0 }
 0x622   : > { %1174 = vadd.xlane.f32.xlu0 %v1173_v17 }
 0x68d   : > { %v1172_v20 = vpop.xlane.xlu2 %1171 }
 0x68e   : > { %v1176_v21 = vmul.f32 %v1172_v20, %v2278_v4 }
 0x690   : > { %v1178_v22 = vsub.f32 %v1166_v12, %v1176_v21 }
 0x692   : > { %v1180_v23 = vmul.f32 %v1178_v22, %v1178_v22 }
 0x694   : > { %v1182_v24 = vsel %vm820_vm1, %v1180_v23, 0.0 }
 0x695   : > { %v1175_v25 = vpop.xlane.xlu0 %1174  ;;  %1183 = vadd.xlane.f32.xlu2 %v1182_v24 }
 0x696   : > { %v1177_v26 = vmul.f32 %v1175_v25, %v2278_v4 }
 0x698   : > { %v1179_v27 = vsub.f32 %v1167_v16, %v1177_v26 }
 0x69a   : > { %v1181_v28 = vmul.f32 %v1179_v27, %v1179_v27 }
 0x69c   : > { %v1185_v29 = vsel %vm820_vm1, %v1181_v28, 0.0 }
 0x69d   : > { %1186 = vadd.xlane.f32.xlu0 %v1185_v29 }
 0x6ad   : > { %1234 = vperm.xlu2 %1698, %v1229_v31  }
 0x708   : > { %v1184_v32 = vpop.xlane.xlu2 %1183 }
 0x709   : > { %v1188_v33 = vmul.f32 %v1184_v32, %v2278_v4 }
 0x70b   : > { %v1190_v34 = vadd.f32 1e-05, %v1188_v33 }
 0x70d   : > { %1721 = vrsqrt.f32 %v1190_v34  ;;  %vm1198_vm5 = vweird.f32 %v1190_v34 }
 0x710   : > { %v1187_v35 = vpop.xlane.xlu0 %1186  ;;  %v1235_v60 = vpop.permute.xlu2 %1234 }
 0x711   : > { %v1189_v36 = vmul.f32 %v1187_v35, %v2278_v4  ;;  %vm1237_vm11 = vcmp.eq.s32.totalorder %v1235_v60, 1 }
 0x713   : > { %v1722_v37 = vpop.eup %1721  ;;  %v1191_v38 = vadd.f32 1e-05, %v1189_v36 }
 0x714   : > { %v1193_v39 = vmul.f32 %v1722_v37, %v1190_v34  ;;  %vm1199_vm3 = vweird.f32 %v1722_v37 }
 0x715   : > { %1723 = vrsqrt.f32 %v1191_v38  ;;  %vm1200_vm6 = vmor %vm1198_vm5, %vm1199_vm3  ;;  %vm1208_vm9 = vweird.f32 %v1191_v38 }
 0x716   : > { %v1194_v40 = vmul.f32 %v1722_v37, %v1193_v39 }
 0x718   : > { %v1195_v41 = vmul.f32 0.5, %v1194_v40 }
 0x71a   : > { %v1196_v42 = vsub.f32 1.5, %v1195_v41 }
 0x71b   : > { %v1724_v19 = vpop.eup %1723 }
 0x71c   : > { %v1197_v43 = vmul.f32 %v1722_v37, %v1196_v42  ;;  %v1203_v44 = vmul.f32 %v1724_v19, %v1191_v38  ;;  %vm1209_vm7 = vweird.f32 %v1724_v19 }
 0x71d   : > { %vm1210_vm10 = vmor %vm1208_vm9, %vm1209_vm7 }
 0x71e   : > { %v1204_v4 = vmul.f32 %v1724_v19, %v1203_v44  ;;  %v1201_v46 = vsel %vm1200_vm6, %v1722_v37, %v1197_v43 }
 0x71f   : > { %v1212_v50 = vmul.f32 %v1201_v46, %v1178_v22 }
 0x720   : > { %v1205_v51 = vmul.f32 0.5, %v1204_v4 }
 0x721   : > { %v1217_v52 = vmul.f32 %v1705_v45, %v1212_v50 }
 0x722   : > { %v1206_v53 = vsub.f32 1.5, %v1205_v51 }
 0x723   : > { %v1222_v55 = vadd.f32 %v1706_v47, %v1217_v52 }
 0x724   : > { %v1207_v56 = vmul.f32 %v1724_v19, %v1206_v53 }
 0x725   : > { %v1238_v57 = vsel %vm1236_vm8, 0.0, %v1222_v55 }
 0x726   : > { %1240 = vst.msk [vmem:[#allocation10] sm:$0xff] %vm820_vm1, %v1238_v57  ;;  %v1211_v58 = vsel %vm1210_vm10, %v1724_v19, %v1207_v56 }
 0x727   : > { %v1213_v59 = vmul.f32 %v1211_v58, %v1179_v27 }
 0x729   : > { %v1218_v61 = vmul.f32 %v1705_v45, %v1213_v59 }
 0x72a   : > { %1245 = sbr.rel (%p1578_p3) target bundleno = 1841 (0x731), region = 100 }
 0x72b   : > { %v1223_v62 = vadd.f32 %v1706_v47, %v1218_v61 }
 0x72d   : > { %v1239_v63 = vsel %vm1237_vm11, 0.0, %v1223_v62 }
 0x72e   : > { %1241 = vst.msk [vmem:[#allocation10 + $0x8] sm:$0xff] %vm820_vm1, %v1239_v63 }
 0x72f   : > { %1246 = vst.msk [vmem:[#allocation11] sm:$0xff] %vm900_vm4, %v2256_v48 }
 0x730   : > { %1247 = vst.msk [vmem:[#allocation11 + $0x8] sm:$0xff] %vm900_vm4, %v2261_v54 }
 0x731 PF: > { %p1634_p4 = scmp.eq.s32.totalorder %s2125_s24, 2  ;;  %s2431_s18 = sld [smem:[#allocation32_spill]] }
 0x732   : > { %s1976_s16 = smov [#allocation10]   ;;  %s1977_s21 = smov 128  }
 0x733   : > { %s1256_s2 = sshll.u32 %s1976_s16, 4  ;;  %s1978_s23 = smov 8   ;;  %s1257_s2 = int_to_ptr.vmem [resolvable:$true] %s1256_s2 }
 0x734   : > { %s1979_s0 = smov [#allocation11]   ;;  %s2432_s17 = sld [smem:[#allocation33_spill]] }
 0x735   : > { %s1273_s27 = sshll.u32 %s1979_s0, 4  ;;  %s1274_s27 = int_to_ptr.vmem [resolvable:$true] %s1273_s27 }
 0x737   : > { %s1258_s11 = sshll.u32 %s2431_s18, 4  ;;  %s1259_s11 = int_to_ptr.hbm [resolvable:$true] %s1258_s11 }
 0x738   : > { %1610 = dma.vmem_to_hbm [thread:$0]  (%p1634_p4), %s1257_s2, 256, %s1259_s11, [#allocation4], %s1977_s21, %s1977_s21, %s1978_s23  }
 0x73a   : > { %s1275_s14 = sshll.u32 %s2432_s17, 4  ;;  %s1276_s14 = int_to_ptr.hbm [resolvable:$true] %s1275_s14 }
 0x73b   : > { %1612 = dma.vmem_to_hbm [thread:$0]  (%p1634_p4), %s1274_s27, 256, %s1276_s14, [#allocation12], %s1977_s21, %s1977_s21, %s1978_s23  }
 0x73c   : > { %1938 = dma.done.wait (%p1634_p4), [#allocation4], 256  }
 0x73d   : > { %1940 = vsyncadd (%p1634_p4), [#allocation4], 4294967040 }
 0x73e   : > { %1942 = dma.done.wait (%p1634_p4), [#allocation12], 256  }
 0x73f   : > { %1944 = vsyncadd (%p1634_p4), [#allocation12], 4294967040 }
 0x740 PF: > { %s2433_s12 = sld [smem:[#allocation19_spill]]  ;;  %s2437_s18 = smov %s1951_s19 }
 0x741   : > { %s2434_s15 = sld [smem:[#allocation18_spill]]  ;;  %s2439_s21 = smov %s1963_s22 }
 0x742   : > { %s2435_s20 = sld [smem:[#allocation21_spill]] }
 0x743   : > { %s2436_s28 = sld [smem:[#allocation20_spill]] }
 0x746   : > { %s35_s23 = sadd.s32 1, %s2433_s12  }
 0x747   : > { %p32_p5 = scmp.ge.s32.totalorder %s35_s23, 5   ;;  %s2438_s19 = smov %s2434_s15 }
 0x749   : > { %s2440_s22 = smov %s2436_s28  ;;  %34 = sbr.rel (!%p32_p5) target bundleno = 22 (0x16), region = 191 }
 0x74e   :  { %1297 = vsyncpa [#allocation3], 1 }
 0x74f   :  { %1299 = vsyncpa [#allocation3 + $0x1], 1 }
 0x750   :  { %1300 = vsyncpa [#allocation6], 1 }
 0x751   :  { %1302 = vsyncpa [#allocation6 + $0x1], 1 }
 0x752   :  { %1303 = vsyncpa [#allocation9], 1 }
 0x753   :  { %1305 = vsyncpa [#allocation9 + $0x1], 1 }
 0x754   :  { %1306 = vsyncpa [#allocation4], 1 }
 0x755   :  { %1308 = vsyncpa [#allocation4 + $0x1], 1 }
 0x756   :  { %1309 = vsyncpa [#allocation12], 1 }

</bundles_post_ra>
